<compile_context>
chip_gen: v6e
topology: v6e:2x2x1
jax: 0.10.0
libtpu: 0.0.40
codegen_flags: <defaults>
</compile_context>

<pallas_src>
import functools

import jax
import jax.numpy as jnp
from jax.experimental import pallas as pl
from jax.experimental.pallas import tpu as pltpu

LANE = 128
TI = 64          # target-row tile (kept at 64: channel loop stays within the 64-vreg file)
TJ = 128         # source-col tile (lane-dense)
NEG_INF = -1e30


def _round_up(x, m):
    return (x + m - 1) // m * m


@functools.lru_cache(maxsize=1)
def _vmem_limit_bytes():
    """Generation-aware scoped-VMEM budget (v7x: 64 MiB physical, v5e/v6e: 128 MiB)."""
    try:
        cap = pltpu.get_tpu_info().vmem_capacity_bytes
        return max(32 * 1024 * 1024, min(int(cap * 0.7), 96 * 1024 * 1024))
    except Exception:  # pragma: no cover - conservative fallback
        return 32 * 1024 * 1024


# ----------------------------------------------------------------------------------
# Kernels
# ----------------------------------------------------------------------------------
def fused_proj_kernel(x_ref, w_ref, b_ref, o_ref):
    """xlr = x @ [W_l | W_r] + [b_l | b_r]  (bf16 MXU matmul, f32 acc, bf16 output)."""
    o_ref[...] = (jnp.dot(x_ref[...], w_ref[...],
                          preferred_element_type=jnp.float32)
                  + b_ref[...]).astype(o_ref.dtype)


def gatv2_attn_kernel(occ_ref, xl_ref, xlt_ref, xr_ref, adj_ref, ew_ref, slab_ref,
                      o_ref, m_sc, l_sc, acc_sc,
                      *, f_out, negative_slope, out_act_slope):
    """One (target_i, source_j) tile of a GATv2 layer.

    Grid = (num_i_tiles, num_j_tiles); j (source) is the reduction axis ("arbitrary"),
    i is "parallel".  Logits are built by an unrolled per-channel loop (register-blocked,
    no 3-D temporaries); the masked softmax is online (flash-style) with f32 stats; the
    whole body is skipped for tiles with no edges via the prefetched occupancy table.
    """
    i = pl.program_id(0)
    j = pl.program_id(1)
    nj = pl.num_programs(1)

    @pl.when(j == 0)
    def _init():
        m_sc[...] = jnp.full_like(m_sc, NEG_INF)
        l_sc[...] = jnp.zeros_like(l_sc)
        acc_sc[...] = jnp.zeros_like(acc_sc)

    @pl.when(occ_ref[i * nj + j] > 0)
    def _tile_body():
        ew = ew_ref[...].astype(jnp.float32)            # (TI, TJ) edge weights
        xr_b = xr_ref[...]                              # (TI, C)  lin_r(x), bf16, target side
        xlt_b = xlt_ref[...]                            # (r8, TJ) lin_l(x)^T, bf16, source side
        we_row = slab_ref[0:1, :]                       # (1, C) lin_edge weight
        att_row = slab_ref[1:2, :]                      # (1, C) attention vector

        # Additive mask bias (0 for edges, -1e30 otherwise) seeds the logits.
        s = adj_ref[...].astype(jnp.float32)            # (TI, TJ)
        for c in range(f_out):                          # unrolled; ~8-vreg register-resident chain
            z = (ew * we_row[:, c:c + 1]
                 + (xr_b[:, c:c + 1].astype(jnp.float32)
                    + xlt_b[c:c + 1, :].astype(jnp.float32)))
            z = jnp.maximum(z, negative_slope * z)      # leaky_relu as max
            s = s + att_row[:, c:c + 1] * z

        # Flash-style online masked softmax over source tiles (stats in f32).
        m_prev = m_sc[...]
        m_new = jnp.maximum(m_prev, jnp.max(s, axis=-1, keepdims=True))
        scale = jnp.exp(m_prev - m_new)
        p = jnp.exp(s - m_new)                          # masked entries underflow to 0.0
        l_sc[...] = scale * l_sc[...] + jnp.sum(p, axis=-1, keepdims=True)
        acc_sc[...] = scale * acc_sc[...] + jnp.dot(
            p.astype(jnp.bfloat16), xl_ref[...],
            preferred_element_type=jnp.float32)         # (TI, C), bf16 MXU, f32 acc
        m_sc[...] = m_new

    @pl.when(j == nj - 1)
    def _finalize():
        bias = slab_ref[2:3, :]                         # (1, C)
        l = l_sc[...]
        inv = pl.reciprocal(jnp.where(l > 0, l, 1.0), approx=True)
        out = acc_sc[...] * inv + bias
        if out_act_slope is not None:                   # inter-layer F.leaky_relu
            out = jnp.maximum(out, out_act_slope * out)
        o_ref[...] = out.astype(o_ref.dtype)


# ----------------------------------------------------------------------------------
# Layer wrapper
# ----------------------------------------------------------------------------------
def gatv2_layer(x_pad, p, adj_bias, ew, occ, *, out_act_slope, ti=TI, tj=TJ):
    n_pad, f_in_pad = x_pad.shape
    w, b, slab = p["w_lr"], p["b_lr"], p["slab"]
    assert w.shape[0] == f_in_pad
    c2 = w.shape[1]
    c_pad = c2 // 2
    f_out = p["f_out"]
    r8 = _round_up(f_out, 8)
    vmem_limit = _vmem_limit_bytes()

    x_bf = x_pad.astype(jnp.bfloat16)

    # Largest row tile that divides n_pad (projection is HBM-bound -> bigger is better).
    tp = 128
    for cand in (512, 256):
        if n_pad % cand == 0:
            tp = cand
            break
    tp = min(tp, n_pad)

    # (1) fused lin_l / lin_r projection (bf16 in / bf16 out, f32 accumulation).
    xlr = pl.pallas_call(
        fused_proj_kernel,
        out_shape=jax.ShapeDtypeStruct((n_pad, c2), jnp.bfloat16),
        grid_spec=pltpu.PrefetchScalarGridSpec(
            num_scalar_prefetch=0,
            grid=(n_pad // tp,),
            in_specs=[pl.BlockSpec((tp, f_in_pad), lambda i: (i, 0)),
                      pl.BlockSpec((f_in_pad, c2), lambda i: (0, 0)),
                      pl.BlockSpec((1, c2), lambda i: (0, 0))],
            out_specs=pl.BlockSpec((tp, c2), lambda i: (i, 0))),
        compiler_params=pltpu.CompilerParams(
            dimension_semantics=("parallel",),
            vmem_limit_bytes=vmem_limit),
        cost_estimate=pl.CostEstimate(
            flops=int(2 * n_pad * f_in_pad * c2),
            transcendentals=0,
            bytes_accessed=int(2 * (n_pad * f_in_pad + f_in_pad * c2 + n_pad * c2))),
    )(x_bf, w, b)

    # Transposed copy of lin_l(x) (only the real channels) for the per-channel logit loop.
    xlt = jnp.transpose(xlr[:, :r8])                    # (r8, n_pad) bf16, tiny XLA transpose

    # (2) tiled attention + aggregation with online softmax and tile-occupancy gating.
    kernel = functools.partial(gatv2_attn_kernel, f_out=f_out,
                               negative_slope=0.2, out_act_slope=out_act_slope)
    grid = (n_pad // ti, n_pad // tj)
    return pl.pallas_call(
        kernel,
        out_shape=jax.ShapeDtypeStruct((n_pad, c_pad), jnp.float32),
        grid_spec=pltpu.PrefetchScalarGridSpec(
            num_scalar_prefetch=1,                      # occupancy table -> SMEM
            grid=grid,
            in_specs=[
                pl.BlockSpec((tj, c_pad), lambda i, j, occ: (j, 0)),   # x_l  (source rows)
                pl.BlockSpec((r8, tj), lambda i, j, occ: (0, j)),      # x_l^T (source cols)
                pl.BlockSpec((ti, c_pad), lambda i, j, occ: (i, 1)),   # x_r  (target rows)
                pl.BlockSpec((ti, tj), lambda i, j, occ: (i, j)),      # additive mask bias (bf16)
                pl.BlockSpec((ti, tj), lambda i, j, occ: (i, j)),      # edge weights (bf16)
                pl.BlockSpec((8, c_pad), lambda i, j, occ: (0, 0)),    # packed W_e/att/bias slab
            ],
            out_specs=pl.BlockSpec((ti, c_pad), lambda i, j, occ: (i, 0)),
            scratch_shapes=[pltpu.VMEM((ti, 1), jnp.float32),          # running max
                            pltpu.VMEM((ti, 1), jnp.float32),          # running sum
                            pltpu.VMEM((ti, c_pad), jnp.float32)]),    # accumulator
        compiler_params=pltpu.CompilerParams(
            dimension_semantics=("parallel", "arbitrary"),
            vmem_limit_bytes=vmem_limit),
        cost_estimate=pl.CostEstimate(
            flops=int(n_pad * n_pad * (7 * f_out + 2 * c_pad + 8)),
            transcendentals=int(n_pad * n_pad),
            bytes_accessed=int(4 * n_pad * n_pad + 10 * n_pad * c_pad)),
    )(occ, xlr, xlt, xlr, adj_bias, ew, slab)


# ----------------------------------------------------------------------------------
# Graph densification + parameters (JAX glue)
# ----------------------------------------------------------------------------------
def to_dense_graph(edge_index, edge_weight, n, n_pad, ti, tj):
    """Dense additive-mask bias (bf16: 0 / -1e30), edge-weight matrix (bf16) indexed
    [target_i, source_j], PyG-style self loops (remove existing, add with
    fill_value='mean'), plus an int32 per-tile occupancy table for block skipping."""
    # TODO(synk): duplicate (multi-)edges are collapsed (weights summed), unlike PyG.
    src, dst = edge_index[0], edge_index[1]
    ew_f = edge_weight.astype(jnp.float32)
    keep = (src != dst).astype(jnp.float32)

    a01 = jnp.zeros((n_pad, n_pad), jnp.float32).at[dst, src].add(keep)
    a01 = jnp.minimum(a01, 1.0)
    ew = jnp.zeros((n_pad, n_pad), jnp.float32).at[dst, src].add(ew_f * keep)

    deg = jnp.zeros((n_pad,), jnp.float32).at[dst].add(keep)
    wsum = jnp.zeros((n_pad,), jnp.float32).at[dst].add(ew_f * keep)
    self_val = jnp.where(deg > 0, wsum / jnp.maximum(deg, 1.0), 0.0)

    idx = jnp.arange(n)                      # self loops only on real nodes
    a01 = a01.at[idx, idx].set(1.0)
    ew = ew.at[idx, idx].set(self_val[:n])

    adj_bias = jnp.where(a01 > 0, 0.0, NEG_INF).astype(jnp.bfloat16)
    occ = (a01.reshape(n_pad // ti, ti, n_pad // tj, tj)
              .sum(axis=(1, 3)) > 0).astype(jnp.int32).reshape(-1)
    return adj_bias, ew.astype(jnp.bfloat16), occ


def init_gatv2_params(key, f_in, f_out, f_in_pad, c_pad):
    ks = jax.random.split(key, 7)

    def glorot(k, shape):
        fan = shape[0] + shape[1]
        return jax.random.normal(k, shape, jnp.float32) * jnp.sqrt(2.0 / fan)

    w_l = glorot(ks[0], (f_in, f_out))
    b_l = 0.01 * jax.random.normal(ks[1], (1, f_out), jnp.float32)
    w_r = glorot(ks[2], (f_in, f_out))
    b_r = 0.01 * jax.random.normal(ks[3], (1, f_out), jnp.float32)
    w_e = glorot(ks[4], (1, f_out))
    att = glorot(ks[5], (1, f_out))
    bias = 0.01 * jax.random.normal(ks[6], (1, f_out), jnp.float32)

    # Fused + zero-padded [W_l | W_r] / [b_l | b_r]  (lane-dense, 2*c_pad wide).
    w_lr = jnp.zeros((f_in_pad, 2 * c_pad), jnp.float32)
    w_lr = w_lr.at[:f_in, :f_out].set(w_l).at[:f_in, c_pad:c_pad + f_out].set(w_r)
    b_lr = jnp.zeros((1, 2 * c_pad), jnp.float32)
    b_lr = b_lr.at[:, :f_out].set(b_l).at[:, c_pad:c_pad + f_out].set(b_r)

    # Packed slab of small vectors: row0 = W_e, row1 = att, row2 = bias.
    slab = jnp.zeros((8, c_pad), jnp.float32)
    slab = (slab.at[0, :f_out].set(w_e[0])
                .at[1, :f_out].set(att[0])
                .at[2, :f_out].set(bias[0]))
    return dict(w_lr=w_lr.astype(jnp.bfloat16), b_lr=b_lr, slab=slab, f_out=f_out)


def init_gat_params(key, in_channels, layer_sizes):
    dims = [in_channels] + list(layer_sizes)
    keys = jax.random.split(key, len(layer_sizes))
    return [init_gatv2_params(keys[i], dims[i], dims[i + 1],
                              _round_up(dims[i], LANE), _round_up(dims[i + 1], LANE))
            for i in range(len(layer_sizes))]


def gat_forward(params_list, x, edge_index, edge_weight):
    """Mirrors GAT.forward: F.leaky_relu (slope 0.01) between layers, none on last."""
    n, f_in = x.shape
    n_pad = _round_up(n, LANE)
    ti, tj = min(TI, n_pad), min(TJ, n_pad)

    f_in_pad = params_list[0]["w_lr"].shape[0]
    x_pad = jnp.zeros((n_pad, f_in_pad), jnp.float32).at[:n, :f_in].set(
        x.astype(jnp.float32))

    adj_bias, ew, occ = to_dense_graph(edge_index, edge_weight, n, n_pad, ti, tj)

    h = x_pad
    for i, p in enumerate(params_list):
        last = i == len(params_list) - 1
        h = gatv2_layer(h, p, adj_bias, ew, occ,
                        out_act_slope=None if last else 0.01, ti=ti, tj=tj)
    return h[:n, :params_list[-1]["f_out"]]


if __name__ == "__main__":
    key = jax.random.PRNGKey(0)
    k_param, k_x, k_w = jax.random.split(key, 3)

    N, F_IN = 8, 8
    LAYER_SIZES = [32, 32]

    params = init_gat_params(k_param, F_IN, LAYER_SIZES)
    x = jax.random.normal(k_x, (N, F_IN), jnp.float32)

    # deterministic bidirectional ring graph: 2*N edges, no self loops
    src = jnp.arange(N, dtype=jnp.int32)
    dst = (src + 1) % N
    edge_index = jnp.stack([jnp.concatenate([src, dst]),
                            jnp.concatenate([dst, src])])        # (2, 16)
    edge_weight = jax.random.normal(k_w, (2 * N,), jnp.float32)  # (16,)

    out = gat_forward(params, x, edge_index, edge_weight)
    out = jax.block_until_ready(out)
    assert out.shape == (N, LAYER_SIZES[-1])
    assert bool(jnp.all(jnp.isfinite(out)))
    print("KERNEL_OK")
</pallas_src>

<mosaic_0001>
module attributes {stable_mosaic.version = 11 : i64} {
  func.func @fused_proj_kernel(%arg0: i32, %arg1: memref<128x128xbf16, #tpu.memory_space<vmem>>, %arg2: memref<128x256xbf16, #tpu.memory_space<vmem>>, %arg3: memref<1x256xf32, #tpu.memory_space<vmem>>, %arg4: memref<128x256xbf16, #tpu.memory_space<vmem>>) attributes {dimension_semantics = [#tpu.dimension_semantics<parallel>], iteration_bounds = array<i64: 1>, scalar_prefetch = 0 : i64, scratch_operands = 0 : i64, tpu.core_type = #tpu.core_type<tc>, window_params = [{transform_indices = @transform_0, window_bounds = array<i64: 128, 128>}, {pipeline_mode = #tpu.pipeline_mode<synchronous>, transform_indices = @transform_1, window_bounds = array<i64: 128, 256>}, {pipeline_mode = #tpu.pipeline_mode<synchronous>, transform_indices = @transform_2, window_bounds = array<i64: 1, 256>}, {transform_indices = @transform_3, window_bounds = array<i64: 128, 256>}]} {
    %c0 = arith.constant 0 : index
    %c0_0 = arith.constant 0 : index
    %0 = vector.load %arg1[%c0, %c0_0] : memref<128x128xbf16, #tpu.memory_space<vmem>>, vector<128x128xbf16>
    %c0_1 = arith.constant 0 : index
    %c0_2 = arith.constant 0 : index
    %1 = vector.load %arg2[%c0_1, %c0_2] : memref<128x256xbf16, #tpu.memory_space<vmem>>, vector<128x256xbf16>
    %cst = arith.constant dense<0.000000e+00> : vector<128x256xf32>
    %2 = tpu.matmul %0, %1, %cst {dimension_numbers = #tpu.dot_dimension_numbers<[1], [0], [0], [1], [0, 0, 1, 1], [], []>} : vector<128x128xbf16>, vector<128x256xbf16>, vector<128x256xf32> -> vector<128x256xf32>
    %c0_3 = arith.constant 0 : index
    %c0_4 = arith.constant 0 : index
    %3 = vector.load %arg3[%c0_3, %c0_4] : memref<1x256xf32, #tpu.memory_space<vmem>>, vector<1x256xf32>
    %4 = vector.broadcast %3 : vector<1x256xf32> to vector<128x256xf32>
    %5 = arith.addf %2, %4 : vector<128x256xf32>
    %6 = arith.truncf %5 : vector<128x256xf32> to vector<128x256xbf16>
    %c0_5 = arith.constant 0 : index
    %c0_6 = arith.constant 0 : index
    %7 = vector.load %arg4[%c0_5, %c0_6] : memref<128x256xbf16, #tpu.memory_space<vmem>>, vector<128x256xbf16>
    tpu.vector_store %arg4[%c0_5, %c0_6], %6 {strides = array<i32>} : memref<128x256xbf16, #tpu.memory_space<vmem>>, vector<128x256xbf16>,
    return
  }
  func.func @transform_0(%arg0: i32) -> (i32, i32) {
    %c0_i32 = arith.constant 0 : i32
    %c0_i32_0 = arith.constant 0 : i32
    return %arg0, %c0_i32 : i32, i32
  }
  func.func @transform_1(%arg0: i32) -> (i32, i32) {
    %c0_i32 = arith.constant 0 : i32
    %c0_i32_0 = arith.constant 0 : i32
    %c0_i32_1 = arith.constant 0 : i32
    return %c0_i32, %c0_i32_0 : i32, i32
  }
  func.func @transform_2(%arg0: i32) -> (i32, i32) {
    %c0_i32 = arith.constant 0 : i32
    %c0_i32_0 = arith.constant 0 : i32
    %c0_i32_1 = arith.constant 0 : i32
    return %c0_i32, %c0_i32_0 : i32, i32
  }
  func.func @transform_3(%arg0: i32) -> (i32, i32) {
    %c0_i32 = arith.constant 0 : i32
    %c0_i32_0 = arith.constant 0 : i32
    return %arg0, %c0_i32 : i32, i32
  }
}

</mosaic_0001>

<bundles_post_ra>
// kernel: tpu_custom_call.1
= control target key start
LH: loop header
LB: loop body
LE: loop exit
PB: predicated region body
PF: predicated region fallthrough
CT: control target
= control target key end

     0   :  { %8 = vsyncpa [#allocation3], 0  ;;  %s727_s0 = inlined_call_operand.hbm [shape: bf16[128,128], index: 0, kind: input, shape index: {}]   ;;  %s728_s1 = inlined_call_operand.hbm [shape: bf16[128,256], index: 1, kind: input, shape index: {}]   ;;  %s729_s2 = inlined_call_operand.vmem [shape: f32[1,256], index: 2, kind: input, shape index: {}]   ;;  %s730_s3 = inlined_call_operand.hbm [shape: bf16[128,256], index: 3, kind: output, shape index: {}]  }
   0x1   :  { %9 = vsyncpa [#allocation6], 0 }
   0x2   :  { %10 = vsyncpa [#allocation4], 0  ;;  %s637_s12 = smov [#allocation2]  }
   0x3   :  { %s16_s13 = sshll.u32 %s637_s12, 4  ;;  %s17_s13 = int_to_ptr.vmem [resolvable:$true] %s16_s13 }
   0x4   :  { %s579_s14 = scalar_lea.vmem %s17_s13, 1024  ;;  %p584_p1 = scmp.lt.s32.totalorder %s17_s13, %s17_s13 }
   0x5   :  { %p580_p0 = scmp.ne.s32.totalorder %s17_s13, %s579_s14  ;;  %p585_p2 = scmp.lt.s32.totalorder %s579_s14, %s579_s14 }
   0x7   :  { %p586_p3 = por %p585_p2, %p584_p1 }
   0x9   :  { %p587_p4 = pnand %p586_p3, %p580_p0 }
   0xb   :  { %590 = shalt.err (!%p587_p4)
}
   0xc   :  { %s638_s15 = smov 64   ;;  %s639_s16 = smov 4  }
   0xd   :  { %22 = dma.hbm_to_vmem [thread:$0]  %s727_s0, 1024, %s17_s13, [#allocation3], %s638_s15, %s638_s15, %s639_s16  }
   0xe   :  { %s640_s19 = smov [#allocation5]  }
   0xf   :  { %s28_s20 = sshll.u32 %s640_s19, 4  ;;  %s29_s20 = int_to_ptr.vmem [resolvable:$true] %s28_s20 }
  0x10   :  { %s599_s21 = scalar_lea.vmem %s29_s20, 2048  ;;  %p604_p6 = scmp.lt.s32.totalorder %s29_s20, %s29_s20 }
  0x11   :  { %p600_p5 = scmp.ne.s32.totalorder %s29_s20, %s599_s21  ;;  %p605_p7 = scmp.lt.s32.totalorder %s599_s21, %s599_s21 }
  0x13   :  { %p606_p8 = por %p605_p7, %p604_p6 }
  0x15   :  { %p607_p9 = pnand %p606_p8, %p600_p5 }
  0x17   :  { %610 = shalt.err (!%p607_p9)
}
  0x18   :  { %s641_s22 = smov 128   ;;  %s642_s23 = smov 8  }
  0x19   :  { %34 = dma.hbm_to_vmem [thread:$0]  %s728_s1, 2048, %s29_s20, [#allocation6], %s641_s22, %s641_s22, %s642_s23  }
  0x1a   :  { %631 = dma.done.wait [#allocation3], 1024  }
  0x1b   :  { %632 = vsyncadd [#allocation3], 4294966272 }
  0x1c   :  { %633 = dma.done.wait [#allocation6], 2048  }
  0x1d   :  { %634 = vsyncadd [#allocation6], 4294965248  ;;  %v643_v0 = vmov 0   ;;  %v539_v1 = vld [vmem:[#allocation5 + $0x74] ss:$8 sps:$4 sm:$0xff]   ;;  %v563_v17 = vld [vmem:[#allocation2] sm:$0xff]   ;;  %v78_v25 = vlaneseq }
  0x1e   :  { %248 = vmatprep.mubr.bf16.mxu0 %v643_v0  ;;  %288 = vmatprep.mubr.bf16.mxu1 %v643_v0  ;;  %v541_v2 = vld [vmem:[#allocation5 + $0x70] ss:$8 sps:$4 sm:$0xff]   ;;  %v542_v3 = vld [vmem:[#allocation5 + $0x64] ss:$8 sps:$4 sm:$0xff]   ;;  %v544_v4 = vld [vmem:[#allocation5 + $0x60] ss:$8 sps:$4 sm:$0xff]  }
  0x1f   :  { %216 = vmatprep.subr.bf16.mxu0 %v539_v1  ;;  %515 = vmatprep.subr.bf16.mxu1 %v539_v1  ;;  %v545_v5 = vld [vmem:[#allocation5 + $0x54] ss:$8 sps:$4 sm:$0xff]   ;;  %v547_v6 = vld [vmem:[#allocation5 + $0x50] ss:$8 sps:$4 sm:$0xff]   ;;  %v548_v7 = vld [vmem:[#allocation5 + $0x44] ss:$8 sps:$4 sm:$0xff]  }
  0x20   :  { %217 = vmatpush1.bf16.msra.mxu0 %v541_v2  ;;  %523 = vmatpush1.bf16.msra.mxu1 %v541_v2  ;;  %v550_v8 = vld [vmem:[#allocation5 + $0x40] ss:$8 sps:$4 sm:$0xff]   ;;  %v551_v9 = vld [vmem:[#allocation5 + $0x34] ss:$8 sps:$4 sm:$0xff]   ;;  %v553_v10 = vld [vmem:[#allocation5 + $0x30] ss:$8 sps:$4 sm:$0xff]  }
  0x21   :  { %218 = vmatprep.subr.bf16.mxu0 %v542_v3  ;;  %516 = vmatprep.subr.bf16.mxu1 %v542_v3  ;;  %v554_v11 = vld [vmem:[#allocation5 + $0x24] ss:$8 sps:$4 sm:$0xff]   ;;  %v556_v12 = vld [vmem:[#allocation5 + $0x20] ss:$8 sps:$4 sm:$0xff]   ;;  %v557_v13 = vld [vmem:[#allocation5 + $0x14] ss:$8 sps:$4 sm:$0xff]  }
  0x22   :  { %v559_v14 = vld [vmem:[#allocation5 + $0x10] ss:$8 sps:$4 sm:$0xff]   ;;  %v560_v15 = vld [vmem:[#allocation5 + $0x4] ss:$8 sps:$4 sm:$0xff]   ;;  %v562_v16 = vld [vmem:[#allocation5] ss:$8 sps:$4 sm:$0xff]  }
  0x23   :  { %v564_v18 = vld [vmem:[#allocation2 + $0x20] sm:$0xff]   ;;  %v565_v19 = vld [vmem:[#allocation2 + $0x8] sm:$0xff]   ;;  %v567_v21 = vld [vmem:[#allocation2 + $0x10] sm:$0xff]   ;;  %v79_v26 = vshrl.u32 %v78_v25, 7 }
  0x24   :  { %219 = vmatpush1.bf16.msra.mxu0 %v544_v4  ;;  %524 = vmatpush1.bf16.msra.mxu1 %v544_v4  ;;  %v566_v20 = vld [vmem:[#allocation2 + $0x28] sm:$0xff]   ;;  %v568_v22 = vld [vmem:[#allocation2 + $0x30] sm:$0xff]   ;;  %v569_v23 = vld [vmem:[#allocation2 + $0x18] sm:$0xff]  }
  0x25   :  { %220 = vmatprep.subr.bf16.mxu0 %v545_v5  ;;  %517 = vmatprep.subr.bf16.mxu1 %v545_v5  ;;  %v570_v24 = vld [vmem:[#allocation2 + $0x38] sm:$0xff]   ;;  %v80_v27 = vsub.s32 0, %v79_v26  ;;  %v84_v28 = vsub.s32 1, %v79_v26  ;;  %v76_v29 = vld [vmem:[%s729_s2] sm:$0x3]  ;;  %s644_s2 = smov [#allocation7]  }
  0x26   :  { %s446_s26 = sshll.u32 %s644_s2, 4  ;;  %s447_s26 = int_to_ptr.vmem [resolvable:$true] %s446_s26 }
  0x27   :  { %v685_v30 = vrot.slane %v76_v29, %v80_v27  ;;  %v687_v31 = vrot.slane %v76_v29, %v84_v28  ;;  %s611_s27 = scalar_lea.vmem %s447_s26, 2048  ;;  %p616_p11 = scmp.lt.s32.totalorder %s447_s26, %s447_s26 }
  0x28   :  { %221 = vmatpush1.bf16.msra.mxu0 %v547_v6  ;;  %525 = vmatpush1.bf16.msra.mxu1 %v547_v6  ;;  %p612_p10 = scmp.ne.s32.totalorder %s447_s26, %s611_s27  ;;  %p617_p12 = scmp.lt.s32.totalorder %s611_s27, %s611_s27 }
  0x29   :  { %222 = vmatprep.subr.bf16.mxu0 %v548_v7  ;;  %518 = vmatprep.subr.bf16.mxu1 %v548_v7 }
  0x2a   :  { %p618_p13 = por %p617_p12, %p616_p11 }
  0x2c   :  { %223 = vmatpush1.bf16.msra.mxu0 %v550_v8  ;;  %526 = vmatpush1.bf16.msra.mxu1 %v550_v8  ;;  %p619_p0 = pnand %p618_p13, %p612_p10 }
  0x2d   :  { %224 = vmatprep.subr.bf16.mxu0 %v551_v9  ;;  %519 = vmatprep.subr.bf16.mxu1 %v551_v9 }
  0x30   :  { %225 = vmatpush1.bf16.msra.mxu0 %v553_v10  ;;  %527 = vmatpush1.bf16.msra.mxu1 %v553_v10 }
  0x31   :  { %226 = vmatprep.subr.bf16.mxu0 %v554_v11  ;;  %520 = vmatprep.subr.bf16.mxu1 %v554_v11 }
  0x34   :  { %227 = vmatpush1.bf16.msra.mxu0 %v556_v12  ;;  %528 = vmatpush1.bf16.msra.mxu1 %v556_v12 }
  0x35   :  { %228 = vmatprep.subr.bf16.mxu0 %v557_v13  ;;  %521 = vmatprep.subr.bf16.mxu1 %v557_v13 }
  0x38   :  { %229 = vmatpush1.bf16.msra.mxu0 %v559_v14  ;;  %529 = vmatpush1.bf16.msra.mxu1 %v559_v14 }
  0x39   :  { %230 = vmatprep.subr.bf16.mxu0 %v560_v15  ;;  %522 = vmatprep.subr.bf16.mxu1 %v560_v15 }
  0x3c   :  { %231 = vmatpush1.bf16.msra.mxu0 %v562_v16  ;;  %530 = vmatpush1.bf16.msra.mxu1 %v562_v16 }
  0x3f   :  { %249 = vmatmul.mubr.bf16.vlgmr.msra.gmra.mxu0 %v563_v17  ;;  %289 = vmatmul.mubr.bf16.vlgmr.msra.gmra.mxu1 %v564_v18 }
  0x40   :  { %258 = vmatprep.mubr.bf16.mxu0 %v643_v0  ;;  %298 = vmatprep.mubr.bf16.mxu1 %v643_v0 }
  0x47   :  { %259 = vmatmul.mubr.bf16.gmra.mxu0 %v565_v19  ;;  %299 = vmatmul.mubr.bf16.gmra.mxu1 %v566_v20 }
  0x48   :  { %268 = vmatprep.mubr.bf16.mxu0 %v643_v0  ;;  %308 = vmatprep.mubr.bf16.mxu1 %v643_v0 }
  0x4f   :  { %269 = vmatmul.mubr.bf16.gmra.mxu0 %v567_v21  ;;  %309 = vmatmul.mubr.bf16.gmra.mxu1 %v568_v22 }
  0x50   :  { %278 = vmatprep.mubr.bf16.mxu0 %v643_v0  ;;  %318 = vmatprep.mubr.bf16.mxu1 %v643_v0 }
  0x57   :  { %279 = vmatmul.mubr.bf16.gmra.mxu0 %v569_v23  ;;  %319 = vmatmul.mubr.bf16.gmra.mxu1 %v570_v24 }
  0xff   :  { %v250_v32 = vpop.f32.mrf.mxu0  ;;  %v290_v33 = vpop.f32.mrf.mxu1 }
 0x100   :  { %v251_v36 = vadd.f32 %v250_v32, %v685_v30  ;;  %v291_v37 = vadd.f32 %v290_v33, %v685_v30 }
 0x101   :  { %v252_v34 = vpop.f32.mrf.mxu0  ;;  %v292_v35 = vpop.f32.mrf.mxu1 }
 0x102   :  { %v253_v38 = vadd.f32 %v252_v34, %v687_v31  ;;  %v293_v39 = vadd.f32 %v292_v35, %v687_v31 }
 0x103   :  { %v254_v40 = vpop.f32.mrf.mxu0  ;;  %v294_v41 = vpop.f32.mrf.mxu1 }
 0x104   :  { %v499_v42 = vpack.c.bf16 %v253_v38, %v251_v36  ;;  %v507_v43 = vpack.c.bf16 %v293_v39, %v291_v37  ;;  %v255_v46 = vadd.f32 %v254_v40, %v685_v30  ;;  %v295_v47 = vadd.f32 %v294_v41, %v685_v30 }
 0x105   :  { %v256_v44 = vpop.f32.mrf.mxu0  ;;  %v296_v45 = vpop.f32.mrf.mxu1 }
 0x106   :  { %425 = vst [vmem:[#allocation7] sm:$0xff] %v499_v42  ;;  %433 = vst [vmem:[#allocation7 + $0x40] sm:$0xff] %v507_v43  ;;  %v257_v48 = vadd.f32 %v256_v44, %v687_v31  ;;  %v297_v49 = vadd.f32 %v296_v45, %v687_v31 }
 0x107   :  { %v260_v50 = vpop.f32.mrf.mxu0  ;;  %v300_v51 = vpop.f32.mrf.mxu1 }
 0x108   :  { %v500_v52 = vpack.c.bf16 %v257_v48, %v255_v46  ;;  %v508_v53 = vpack.c.bf16 %v297_v49, %v295_v47  ;;  %v261_v56 = vadd.f32 %v260_v50, %v685_v30  ;;  %v301_v57 = vadd.f32 %v300_v51, %v685_v30 }
 0x109   :  { %v262_v54 = vpop.f32.mrf.mxu0  ;;  %v302_v55 = vpop.f32.mrf.mxu1 }
 0x10a   :  { %426 = vst [vmem:[#allocation7 + $0x8] sm:$0xff] %v500_v52  ;;  %434 = vst [vmem:[#allocation7 + $0x48] sm:$0xff] %v508_v53  ;;  %v263_v58 = vadd.f32 %v262_v54, %v687_v31  ;;  %v303_v59 = vadd.f32 %v302_v55, %v687_v31 }
 0x10b   :  { %v264_v60 = vpop.f32.mrf.mxu0  ;;  %v304_v61 = vpop.f32.mrf.mxu1 }
 0x10c   :  { %v501_v62 = vpack.c.bf16 %v263_v58, %v261_v56  ;;  %v509_v63 = vpack.c.bf16 %v303_v59, %v301_v57  ;;  %v265_v2 = vadd.f32 %v264_v60, %v685_v30  ;;  %v305_v3 = vadd.f32 %v304_v61, %v685_v30 }
 0x10d   :  { %v266_v0 = vpop.f32.mrf.mxu0  ;;  %v306_v1 = vpop.f32.mrf.mxu1 }
 0x10e   :  { %427 = vst [vmem:[#allocation7 + $0x10] sm:$0xff] %v501_v62  ;;  %435 = vst [vmem:[#allocation7 + $0x50] sm:$0xff] %v509_v63  ;;  %v267_v4 = vadd.f32 %v266_v0, %v687_v31  ;;  %v307_v5 = vadd.f32 %v306_v1, %v687_v31 }
 0x10f   :  { %v270_v6 = vpop.f32.mrf.mxu0  ;;  %v310_v7 = vpop.f32.mrf.mxu1 }
 0x110   :  { %v502_v8 = vpack.c.bf16 %v267_v4, %v265_v2  ;;  %v510_v9 = vpack.c.bf16 %v307_v5, %v305_v3  ;;  %v271_v12 = vadd.f32 %v270_v6, %v685_v30  ;;  %v311_v13 = vadd.f32 %v310_v7, %v685_v30 }
 0x111   :  { %v272_v10 = vpop.f32.mrf.mxu0  ;;  %v312_v11 = vpop.f32.mrf.mxu1 }
 0x112   :  { %428 = vst [vmem:[#allocation7 + $0x18] sm:$0xff] %v502_v8  ;;  %436 = vst [vmem:[#allocation7 + $0x58] sm:$0xff] %v510_v9  ;;  %v273_v14 = vadd.f32 %v272_v10, %v687_v31  ;;  %v313_v15 = vadd.f32 %v312_v11, %v687_v31 }
 0x113   :  { %v274_v16 = vpop.f32.mrf.mxu0  ;;  %v314_v17 = vpop.f32.mrf.mxu1 }
 0x114   :  { %v503_v18 = vpack.c.bf16 %v273_v14, %v271_v12  ;;  %v511_v19 = vpack.c.bf16 %v313_v15, %v311_v13  ;;  %v275_v22 = vadd.f32 %v274_v16, %v685_v30  ;;  %v315_v23 = vadd.f32 %v314_v17, %v685_v30 }
 0x115   :  { %v276_v20 = vpop.f32.mrf.mxu0  ;;  %v316_v21 = vpop.f32.mrf.mxu1 }
 0x116   :  { %429 = vst [vmem:[#allocation7 + $0x20] sm:$0xff] %v503_v18  ;;  %437 = vst [vmem:[#allocation7 + $0x60] sm:$0xff] %v511_v19  ;;  %v277_v24 = vadd.f32 %v276_v20, %v687_v31  ;;  %v317_v25 = vadd.f32 %v316_v21, %v687_v31 }
 0x117   :  { %v280_v26 = vpop.f32.mrf.mxu0  ;;  %v320_v27 = vpop.f32.mrf.mxu1 }
 0x118   :  { %v504_v28 = vpack.c.bf16 %v277_v24, %v275_v22  ;;  %v512_v29 = vpack.c.bf16 %v317_v25, %v315_v23  ;;  %v281_v34 = vadd.f32 %v280_v26, %v685_v30  ;;  %v321_v35 = vadd.f32 %v320_v27, %v685_v30 }
 0x119   :  { %v282_v32 = vpop.f32.mrf.mxu0  ;;  %v322_v33 = vpop.f32.mrf.mxu1 }
 0x11a   :  { %430 = vst [vmem:[#allocation7 + $0x28] sm:$0xff] %v504_v28  ;;  %438 = vst [vmem:[#allocation7 + $0x68] sm:$0xff] %v512_v29  ;;  %v283_v36 = vadd.f32 %v282_v32, %v687_v31  ;;  %v323_v37 = vadd.f32 %v322_v33, %v687_v31 }
 0x11b   :  { %v284_v38 = vpop.f32.mrf.mxu0  ;;  %v324_v39 = vpop.f32.mrf.mxu1 }
 0x11c   :  { %v505_v40 = vpack.c.bf16 %v283_v36, %v281_v34  ;;  %v513_v41 = vpack.c.bf16 %v323_v37, %v321_v35  ;;  %v285_v44 = vadd.f32 %v284_v38, %v685_v30  ;;  %v325_v45 = vadd.f32 %v324_v39, %v685_v30 }
 0x11d   :  { %v286_v42 = vpop.f32.mrf.mxu0  ;;  %v326_v43 = vpop.f32.mrf.mxu1 }
 0x11e   :  { %431 = vst [vmem:[#allocation7 + $0x30] sm:$0xff] %v505_v40  ;;  %439 = vst [vmem:[#allocation7 + $0x70] sm:$0xff] %v513_v41  ;;  %v287_v46 = vadd.f32 %v286_v42, %v687_v31  ;;  %v327_v47 = vadd.f32 %v326_v43, %v687_v31 }
 0x120   :  { %v506_v48 = vpack.c.bf16 %v287_v46, %v285_v44  ;;  %v514_v49 = vpack.c.bf16 %v327_v47, %v325_v45 }
 0x122   :  { %432 = vst [vmem:[#allocation7 + $0x38] sm:$0xff] %v506_v48  ;;  %440 = vst [vmem:[#allocation7 + $0x78] sm:$0xff] %v514_v49 }
 0x123   :  { %622 = shalt.err (!%p619_p0)
}
 0x124   :  { %452 = dma.vmem_to_hbm [thread:$0]  %s447_s26, 2048, %s730_s3, [#allocation4], %s641_s22, %s641_s22, %s642_s23  }
 0x125   :  { %635 = dma.done.wait [#allocation4], 2048  }
 0x126   :  { %636 = vsyncadd [#allocation4], 4294965248 }
 0x127   :  { %456 = vsyncpa [#allocation3], 1 }
 0x128   :  { %457 = vsyncpa [#allocation6], 1 }
 0x129   :  { %458 = vsyncpa [#allocation4], 1 }

</bundles_post_ra>
